<compile_context>
chip_gen: v6e
topology: v6e:2x2x1
jax: 0.10.0
libtpu: 0.0.40
codegen_flags: <defaults>
</compile_context>

<pallas_src>
import functools

import jax
import jax.numpy as jnp
from jax import lax
from jax.experimental import pallas as pl
from jax.experimental.pallas import tpu as pltpu

LANE = 128  # pad all feature axes to one full lane tile
SUB = 8     # sublane tile


def rnn1_fused_kernel(x_ref, h0_ref, w1ci_ref, w1h_ref, w2_ref,
                      out_ref, hid_ref, y1_ref, *, T, BP):
    """Whole T-step RNN1 recurrence in a single kernel invocation.

    x_ref   : [T*BP, 128]  per-step static rows [category | input_t | 1 | 0pad]
                           (rows b >= real batch are zero)
    h0_ref  : [BP, 128]    initial hidden (zero padded)
    w1ci_ref: [128, 128]   fused (i2h | i2o) for category+input rows + bias row
                           + constant-1 passthrough column
    w1h_ref : [128, 128]   fused (i2h | i2o) for the hidden rows (zero elsewhere)
    w2_ref  : [128, 128]   o2o weights + bias row (bias row holds -1e30 in
                           padded columns -> no in-loop masking needed)
    out_ref : [T*BP, 128]  per-step log-softmax (padded lanes ~ -1e30)
    hid_ref : [BP, 128]    final-step y1 = [h_T | o1_T | 1 | 0]; wrapper slices
    y1_ref  : VMEM [T*BP, 128] scratch holding y1 for every step
    """
    # ---- prologue (off the serial chain) --------------------------------
    # All x-dependent layer-1 contributions for every timestep in ONE matmul
    # (biases ride in through the constant-1 activation column).
    y1_ref[...] = jnp.dot(x_ref[...], w1ci_ref[...],
                          preferred_element_type=jnp.float32)

    w1h = w1h_ref[...]

    # ---- serial recurrence ----------------------------------------------
    # Per step only: one small matmul + add.  The next hidden rides inside y1
    # (W1_h rows >= hidden_size are zero, so the extra lanes are inert).
    def body(t, h):
        row = pl.multiple_of(t * BP, SUB)
        y1 = y1_ref[pl.ds(row, BP)] + jnp.dot(
            h, w1h, preferred_element_type=jnp.float32)
        y1_ref[pl.ds(row, BP)] = y1
        return y1

    h_T = lax.fori_loop(0, T, body, h0_ref[...], unroll=True)

    # ---- epilogue (off the serial chain) --------------------------------
    # One batched o2o matmul + log-softmax over all T steps.  Lanes >=
    # output_size receive -1e30 via the W2 bias row, so exp underflows to 0
    # exactly like the -inf mask.  Dropout is eval-mode (identity).
    o2 = jnp.dot(y1_ref[...], w2_ref[...], preferred_element_type=jnp.float32)
    m = jnp.max(o2, axis=1, keepdims=True)
    z = o2 - m
    lse = jnp.log(jnp.sum(jnp.exp(z), axis=1, keepdims=True))
    out_ref[...] = z - lse
    hid_ref[...] = h_T          # written exactly once, after the loop


def rnn1_sequence_forward(category, inputs, hidden0, packed):
    """Run T recurrent steps of the RNN1 cell in a single pallas_call.

    category: [B, n_categories], inputs: [T, B, input_size], hidden0: [B, H]
    Returns (log_probs [T, B, output_size], hidden_T [B, H]).
    """
    T, B, input_size = inputs.shape
    n_categories = category.shape[1]
    H = packed["hidden_size"]
    O = packed["output_size"]
    BP = ((B + SUB - 1) // SUB) * SUB   # sublane-pad the batch

    # Static per-step rows: [category | input_t | 1 | 0-pad], lane padded,
    # batch padded with zero rows.  Flattened to [T*BP, 128] in XLA (free).
    x_ci = jnp.zeros((T, BP, LANE), jnp.float32)
    x_ci = x_ci.at[:, :B, :n_categories].set(
        jnp.broadcast_to(category, (T, B, n_categories)))
    x_ci = x_ci.at[:, :B, n_categories:n_categories + input_size].set(inputs)
    x_ci = x_ci.at[:, :B, n_categories + input_size].set(1.0)
    x_flat = x_ci.reshape(T * BP, LANE)

    h0 = jnp.zeros((BP, LANE), jnp.float32).at[:B, :H].set(hidden0)

    kernel = functools.partial(rnn1_fused_kernel, T=T, BP=BP)
    out_pad, hid_pad = pl.pallas_call(
        kernel,
        out_shape=(
            jax.ShapeDtypeStruct((T * BP, LANE), jnp.float32),
            jax.ShapeDtypeStruct((BP, LANE), jnp.float32),
        ),
        grid=(1,),
        in_specs=[
            pl.BlockSpec((T * BP, LANE), lambda i: (0, 0)),   # x_ci  (resident)
            pl.BlockSpec((BP, LANE), lambda i: (0, 0)),       # h0    (resident)
            pl.BlockSpec((LANE, LANE), lambda i: (0, 0)),     # W1_ci (resident)
            pl.BlockSpec((LANE, LANE), lambda i: (0, 0)),     # W1_h  (resident)
            pl.BlockSpec((LANE, LANE), lambda i: (0, 0)),     # W2    (resident)
        ],
        out_specs=(
            pl.BlockSpec((T * BP, LANE), lambda i: (0, 0)),   # log-probs slab
            pl.BlockSpec((BP, LANE), lambda i: (0, 0)),       # final hidden slab
        ),
        scratch_shapes=[pltpu.VMEM((T * BP, LANE), jnp.float32)],  # y1 slab
        compiler_params=pltpu.CompilerParams(
            dimension_semantics=("arbitrary",)),
    )(x_flat, h0, packed["w1_ci"], packed["w1_h"], packed["w2"])

    out = out_pad.reshape(T, BP, LANE)[:, :B, :O]
    return out, hid_pad[:B, :H]


def rnn1_forward(category, inp, hidden, packed):
    """Single cell step (the literal PyTorch forward), as the T=1 case."""
    out, hid = rnn1_sequence_forward(category, inp[None], hidden, packed)
    return out[0], hid


def init_params(key, n_categories, input_size, hidden_size, output_size):
    """nn.Linear-style init (uniform +-1/sqrt(fan_in)); weights stored [in, out]."""
    keys = jax.random.split(key, 6)
    in_ih = n_categories + input_size + hidden_size
    in_oo = hidden_size + output_size

    def u(k, shape, fan_in):
        bound = 1.0 / jnp.sqrt(jnp.float32(fan_in))
        return jax.random.uniform(k, shape, jnp.float32, -bound, bound)

    return {
        "w_i2h": u(keys[0], (in_ih, hidden_size), in_ih),
        "b_i2h": u(keys[1], (hidden_size,), in_ih),
        "w_i2o": u(keys[2], (in_ih, output_size), in_ih),
        "b_i2o": u(keys[3], (output_size,), in_ih),
        "w_o2o": u(keys[4], (in_oo, output_size), in_oo),
        "b_o2o": u(keys[5], (output_size,), in_oo),
    }


def pack_params(params, n_categories, input_size, hidden_size, output_size):
    """Fuse the three Linear layers into 3 lane-padded [128,128] MXU operands.

    W1_* column layout: [i2h (H) | i2o (O) | const-1 | 0-pad]; biases are folded
    via the constant-1 activation column.  W2 maps [h_new | o1 | 1] -> o2 + bias,
    with -1e30 in the bias row for padded output lanes (replaces the in-loop
    iota/where(-inf) mask at zero runtime cost).
    """
    nc, ni, H, O = n_categories, input_size, hidden_size, output_size
    ci = nc + ni  # rows of the static (category+input) block; row `ci` = bias/1

    w1_ci = jnp.zeros((LANE, LANE), jnp.float32)
    w1_ci = w1_ci.at[:ci, :H].set(params["w_i2h"][:ci])
    w1_ci = w1_ci.at[:ci, H:H + O].set(params["w_i2o"][:ci])
    w1_ci = w1_ci.at[ci, :H].set(params["b_i2h"])
    w1_ci = w1_ci.at[ci, H:H + O].set(params["b_i2o"])
    w1_ci = w1_ci.at[ci, H + O].set(1.0)          # propagate the constant 1

    w1_h = jnp.zeros((LANE, LANE), jnp.float32)
    w1_h = w1_h.at[:H, :H].set(params["w_i2h"][ci:])
    w1_h = w1_h.at[:H, H:H + O].set(params["w_i2o"][ci:])

    w2 = jnp.zeros((LANE, LANE), jnp.float32)
    w2 = w2.at[:H + O, :O].set(params["w_o2o"])
    w2 = w2.at[H + O, :O].set(params["b_o2o"])
    w2 = w2.at[H + O, O:].set(-1e30)              # mask for padded output lanes

    return {"w1_ci": w1_ci, "w1_h": w1_h, "w2": w2,
            "hidden_size": H, "output_size": O}


def rnn1_reference_step(category, inp, hidden, params):
    """Pure-JAX reference matching the PyTorch forward (eval-mode dropout)."""
    xc = jnp.concatenate([category, inp, hidden], axis=1)
    h_new = xc @ params["w_i2h"] + params["b_i2h"]
    o1 = xc @ params["w_i2o"] + params["b_i2o"]
    o2 = jnp.concatenate([h_new, o1], axis=1) @ params["w_o2o"] + params["b_o2o"]
    return jax.nn.log_softmax(o2, axis=1), h_new


def rnn1_reference_sequence(category, inputs, hidden0, params):
    def step(h, x):
        out, h_new = rnn1_reference_step(category, x, h, params)
        return h_new, out
    h_T, outs = jax.lax.scan(step, hidden0, inputs)
    return outs, h_T


if __name__ == "__main__":
    B = 2
    T = 8
    n_categories = 8
    input_size = 16
    hidden_size = 32
    output_size = 24

    key = jax.random.PRNGKey(0)
    k_cat, k_inp, k_par = jax.random.split(key, 3)

    category = jax.nn.one_hot(
        jax.random.randint(k_cat, (B,), 0, n_categories), n_categories,
        dtype=jnp.float32)
    inputs = jax.random.normal(k_inp, (T, B, input_size), jnp.float32)
    hidden0 = jnp.zeros((B, hidden_size), jnp.float32)   # RNN1.initHidden()

    params = init_params(k_par, n_categories, input_size, hidden_size, output_size)
    packed = pack_params(params, n_categories, input_size, hidden_size, output_size)

    # Full T-step recurrence in a single pallas_call invocation.
    outs, hid_T = rnn1_sequence_forward(category, inputs, hidden0, packed)
    jax.block_until_ready((outs, hid_T))

    ref_outs, ref_hid_T = rnn1_reference_sequence(category, inputs, hidden0, params)
    assert outs.shape == (T, B, output_size) and hid_T.shape == (B, hidden_size)
    assert jnp.allclose(outs, ref_outs, atol=1e-5, rtol=1e-5)
    assert jnp.allclose(hid_T, ref_hid_T, atol=1e-5, rtol=1e-5)

    # Single-cell call (the literal PyTorch forward signature), T=1 case.
    out1, hid1 = rnn1_forward(category, inputs[0], hidden0, packed)
    jax.block_until_ready((out1, hid1))
    ref_out1, ref_hid1 = rnn1_reference_step(category, inputs[0], hidden0, params)
    assert jnp.allclose(out1, ref_out1, atol=1e-5, rtol=1e-5)
    assert jnp.allclose(hid1, ref_hid1, atol=1e-5, rtol=1e-5)

    print("KERNEL_OK")
</pallas_src>

<mosaic_0001>
module attributes {stable_mosaic.version = 11 : i64} {
  func.func @rnn1_fused_kernel(%arg0: i32, %arg1: memref<64x128xf32, #tpu.memory_space<vmem>>, %arg2: memref<8x128xf32, #tpu.memory_space<vmem>>, %arg3: memref<128x128xf32, #tpu.memory_space<vmem>>, %arg4: memref<128x128xf32, #tpu.memory_space<vmem>>, %arg5: memref<128x128xf32, #tpu.memory_space<vmem>>, %arg6: memref<64x128xf32, #tpu.memory_space<vmem>>, %arg7: memref<8x128xf32, #tpu.memory_space<vmem>>, %arg8: memref<64x128xf32, #tpu.memory_space<vmem>>) attributes {dimension_semantics = [#tpu.dimension_semantics<arbitrary>], iteration_bounds = array<i64: 1>, scalar_prefetch = 0 : i64, scratch_operands = 1 : i64, tpu.core_type = #tpu.core_type<tc>, window_params = [{pipeline_mode = #tpu.pipeline_mode<synchronous>, transform_indices = @transform_0, window_bounds = array<i64: 64, 128>}, {pipeline_mode = #tpu.pipeline_mode<synchronous>, transform_indices = @transform_1, window_bounds = array<i64: 8, 128>}, {pipeline_mode = #tpu.pipeline_mode<synchronous>, transform_indices = @transform_2, window_bounds = array<i64: 128, 128>}, {pipeline_mode = #tpu.pipeline_mode<synchronous>, transform_indices = @transform_3, window_bounds = array<i64: 128, 128>}, {pipeline_mode = #tpu.pipeline_mode<synchronous>, transform_indices = @transform_4, window_bounds = array<i64: 128, 128>}, {pipeline_mode = #tpu.pipeline_mode<synchronous>, transform_indices = @transform_5, window_bounds = array<i64: 64, 128>}, {pipeline_mode = #tpu.pipeline_mode<synchronous>, transform_indices = @transform_6, window_bounds = array<i64: 8, 128>}]} {
    %c0 = arith.constant 0 : index
    %c0_0 = arith.constant 0 : index
    %0 = vector.load %arg1[%c0, %c0_0] : memref<64x128xf32, #tpu.memory_space<vmem>>, vector<64x128xf32>
    %c0_1 = arith.constant 0 : index
    %c0_2 = arith.constant 0 : index
    %1 = vector.load %arg3[%c0_1, %c0_2] : memref<128x128xf32, #tpu.memory_space<vmem>>, vector<128x128xf32>
    %cst = arith.constant dense<0.000000e+00> : vector<64x128xf32>
    %2 = tpu.matmul %0, %1, %cst {dimension_numbers = #tpu.dot_dimension_numbers<[1], [0], [0], [1], [0, 0, 1, 1], [], []>} : vector<64x128xf32>, vector<128x128xf32>, vector<64x128xf32> -> vector<64x128xf32>
    %c0_3 = arith.constant 0 : index
    %c0_4 = arith.constant 0 : index
    %3 = vector.load %arg8[%c0_3, %c0_4] : memref<64x128xf32, #tpu.memory_space<vmem>>, vector<64x128xf32>
    tpu.vector_store %arg8[%c0_3, %c0_4], %2 {strides = array<i32>} : memref<64x128xf32, #tpu.memory_space<vmem>>, vector<64x128xf32>,
    %c0_5 = arith.constant 0 : index
    %c0_6 = arith.constant 0 : index
    %4 = vector.load %arg4[%c0_5, %c0_6] : memref<128x128xf32, #tpu.memory_space<vmem>>, vector<128x128xf32>
    %c0_7 = arith.constant 0 : index
    %c0_8 = arith.constant 0 : index
    %5 = vector.load %arg2[%c0_7, %c0_8] : memref<8x128xf32, #tpu.memory_space<vmem>>, vector<8x128xf32>
    %c0_i32 = arith.constant 0 : i32
    %c8_i32 = arith.constant 8 : i32
    %6 = arith.muli %c0_i32, %c8_i32 : i32
    %7 = tpu.assume_multiple %6, 8 : i32
    %8 = arith.index_cast %7 : i32 to index
    %c0_9 = arith.constant 0 : index
    %9 = vector.load %arg8[%8, %c0_9] : memref<64x128xf32, #tpu.memory_space<vmem>>, vector<8x128xf32>
    %cst_10 = arith.constant dense<0.000000e+00> : vector<8x128xf32>
    %10 = tpu.matmul %5, %4, %cst_10 {dimension_numbers = #tpu.dot_dimension_numbers<[1], [0], [0], [1], [0, 0, 1, 1], [], []>} : vector<8x128xf32>, vector<128x128xf32>, vector<8x128xf32> -> vector<8x128xf32>
    %11 = arith.addf %9, %10 : vector<8x128xf32>
    %12 = arith.index_cast %7 : i32 to index
    %c0_11 = arith.constant 0 : index
    %13 = vector.load %arg8[%12, %c0_11] : memref<64x128xf32, #tpu.memory_space<vmem>>, vector<8x128xf32>
    tpu.vector_store %arg8[%12, %c0_11], %11 {strides = array<i32>} : memref<64x128xf32, #tpu.memory_space<vmem>>, vector<8x128xf32>,
    %c1_i32 = arith.constant 1 : i32
    %c8_i32_12 = arith.constant 8 : i32
    %14 = arith.muli %c1_i32, %c8_i32_12 : i32
    %15 = tpu.assume_multiple %14, 8 : i32
    %16 = arith.index_cast %15 : i32 to index
    %c0_13 = arith.constant 0 : index
    %17 = vector.load %arg8[%16, %c0_13] : memref<64x128xf32, #tpu.memory_space<vmem>>, vector<8x128xf32>
    %cst_14 = arith.constant dense<0.000000e+00> : vector<8x128xf32>
    %18 = tpu.matmul %11, %4, %cst_14 {dimension_numbers = #tpu.dot_dimension_numbers<[1], [0], [0], [1], [0, 0, 1, 1], [], []>} : vector<8x128xf32>, vector<128x128xf32>, vector<8x128xf32> -> vector<8x128xf32>
    %19 = arith.addf %17, %18 : vector<8x128xf32>
    %20 = arith.index_cast %15 : i32 to index
    %c0_15 = arith.constant 0 : index
    %21 = vector.load %arg8[%20, %c0_15] : memref<64x128xf32, #tpu.memory_space<vmem>>, vector<8x128xf32>
    tpu.vector_store %arg8[%20, %c0_15], %19 {strides = array<i32>} : memref<64x128xf32, #tpu.memory_space<vmem>>, vector<8x128xf32>,
    %c2_i32 = arith.constant 2 : i32
    %c8_i32_16 = arith.constant 8 : i32
    %22 = arith.muli %c2_i32, %c8_i32_16 : i32
    %23 = tpu.assume_multiple %22, 8 : i32
    %24 = arith.index_cast %23 : i32 to index
    %c0_17 = arith.constant 0 : index
    %25 = vector.load %arg8[%24, %c0_17] : memref<64x128xf32, #tpu.memory_space<vmem>>, vector<8x128xf32>
    %cst_18 = arith.constant dense<0.000000e+00> : vector<8x128xf32>
    %26 = tpu.matmul %19, %4, %cst_18 {dimension_numbers = #tpu.dot_dimension_numbers<[1], [0], [0], [1], [0, 0, 1, 1], [], []>} : vector<8x128xf32>, vector<128x128xf32>, vector<8x128xf32> -> vector<8x128xf32>
    %27 = arith.addf %25, %26 : vector<8x128xf32>
    %28 = arith.index_cast %23 : i32 to index
    %c0_19 = arith.constant 0 : index
    %29 = vector.load %arg8[%28, %c0_19] : memref<64x128xf32, #tpu.memory_space<vmem>>, vector<8x128xf32>
    tpu.vector_store %arg8[%28, %c0_19], %27 {strides = array<i32>} : memref<64x128xf32, #tpu.memory_space<vmem>>, vector<8x128xf32>,
    %c3_i32 = arith.constant 3 : i32
    %c8_i32_20 = arith.constant 8 : i32
    %30 = arith.muli %c3_i32, %c8_i32_20 : i32
    %31 = tpu.assume_multiple %30, 8 : i32
    %32 = arith.index_cast %31 : i32 to index
    %c0_21 = arith.constant 0 : index
    %33 = vector.load %arg8[%32, %c0_21] : memref<64x128xf32, #tpu.memory_space<vmem>>, vector<8x128xf32>
    %cst_22 = arith.constant dense<0.000000e+00> : vector<8x128xf32>
    %34 = tpu.matmul %27, %4, %cst_22 {dimension_numbers = #tpu.dot_dimension_numbers<[1], [0], [0], [1], [0, 0, 1, 1], [], []>} : vector<8x128xf32>, vector<128x128xf32>, vector<8x128xf32> -> vector<8x128xf32>
    %35 = arith.addf %33, %34 : vector<8x128xf32>
    %36 = arith.index_cast %31 : i32 to index
    %c0_23 = arith.constant 0 : index
    %37 = vector.load %arg8[%36, %c0_23] : memref<64x128xf32, #tpu.memory_space<vmem>>, vector<8x128xf32>
    tpu.vector_store %arg8[%36, %c0_23], %35 {strides = array<i32>} : memref<64x128xf32, #tpu.memory_space<vmem>>, vector<8x128xf32>,
    %c4_i32 = arith.constant 4 : i32
    %c8_i32_24 = arith.constant 8 : i32
    %38 = arith.muli %c4_i32, %c8_i32_24 : i32
    %39 = tpu.assume_multiple %38, 8 : i32
    %40 = arith.index_cast %39 : i32 to index
    %c0_25 = arith.constant 0 : index
    %41 = vector.load %arg8[%40, %c0_25] : memref<64x128xf32, #tpu.memory_space<vmem>>, vector<8x128xf32>
    %cst_26 = arith.constant dense<0.000000e+00> : vector<8x128xf32>
    %42 = tpu.matmul %35, %4, %cst_26 {dimension_numbers = #tpu.dot_dimension_numbers<[1], [0], [0], [1], [0, 0, 1, 1], [], []>} : vector<8x128xf32>, vector<128x128xf32>, vector<8x128xf32> -> vector<8x128xf32>
    %43 = arith.addf %41, %42 : vector<8x128xf32>
    %44 = arith.index_cast %39 : i32 to index
    %c0_27 = arith.constant 0 : index
    %45 = vector.load %arg8[%44, %c0_27] : memref<64x128xf32, #tpu.memory_space<vmem>>, vector<8x128xf32>
    tpu.vector_store %arg8[%44, %c0_27], %43 {strides = array<i32>} : memref<64x128xf32, #tpu.memory_space<vmem>>, vector<8x128xf32>,
    %c5_i32 = arith.constant 5 : i32
    %c8_i32_28 = arith.constant 8 : i32
    %46 = arith.muli %c5_i32, %c8_i32_28 : i32
    %47 = tpu.assume_multiple %46, 8 : i32
    %48 = arith.index_cast %47 : i32 to index
    %c0_29 = arith.constant 0 : index
    %49 = vector.load %arg8[%48, %c0_29] : memref<64x128xf32, #tpu.memory_space<vmem>>, vector<8x128xf32>
    %cst_30 = arith.constant dense<0.000000e+00> : vector<8x128xf32>
    %50 = tpu.matmul %43, %4, %cst_30 {dimension_numbers = #tpu.dot_dimension_numbers<[1], [0], [0], [1], [0, 0, 1, 1], [], []>} : vector<8x128xf32>, vector<128x128xf32>, vector<8x128xf32> -> vector<8x128xf32>
    %51 = arith.addf %49, %50 : vector<8x128xf32>
    %52 = arith.index_cast %47 : i32 to index
    %c0_31 = arith.constant 0 : index
    %53 = vector.load %arg8[%52, %c0_31] : memref<64x128xf32, #tpu.memory_space<vmem>>, vector<8x128xf32>
    tpu.vector_store %arg8[%52, %c0_31], %51 {strides = array<i32>} : memref<64x128xf32, #tpu.memory_space<vmem>>, vector<8x128xf32>,
    %c6_i32 = arith.constant 6 : i32
    %c8_i32_32 = arith.constant 8 : i32
    %54 = arith.muli %c6_i32, %c8_i32_32 : i32
    %55 = tpu.assume_multiple %54, 8 : i32
    %56 = arith.index_cast %55 : i32 to index
    %c0_33 = arith.constant 0 : index
    %57 = vector.load %arg8[%56, %c0_33] : memref<64x128xf32, #tpu.memory_space<vmem>>, vector<8x128xf32>
    %cst_34 = arith.constant dense<0.000000e+00> : vector<8x128xf32>
    %58 = tpu.matmul %51, %4, %cst_34 {dimension_numbers = #tpu.dot_dimension_numbers<[1], [0], [0], [1], [0, 0, 1, 1], [], []>} : vector<8x128xf32>, vector<128x128xf32>, vector<8x128xf32> -> vector<8x128xf32>
    %59 = arith.addf %57, %58 : vector<8x128xf32>
    %60 = arith.index_cast %55 : i32 to index
    %c0_35 = arith.constant 0 : index
    %61 = vector.load %arg8[%60, %c0_35] : memref<64x128xf32, #tpu.memory_space<vmem>>, vector<8x128xf32>
    tpu.vector_store %arg8[%60, %c0_35], %59 {strides = array<i32>} : memref<64x128xf32, #tpu.memory_space<vmem>>, vector<8x128xf32>,
    %c7_i32 = arith.constant 7 : i32
    %c8_i32_36 = arith.constant 8 : i32
    %62 = arith.muli %c7_i32, %c8_i32_36 : i32
    %63 = tpu.assume_multiple %62, 8 : i32
    %64 = arith.index_cast %63 : i32 to index
    %c0_37 = arith.constant 0 : index
    %65 = vector.load %arg8[%64, %c0_37] : memref<64x128xf32, #tpu.memory_space<vmem>>, vector<8x128xf32>
    %cst_38 = arith.constant dense<0.000000e+00> : vector<8x128xf32>
    %66 = tpu.matmul %59, %4, %cst_38 {dimension_numbers = #tpu.dot_dimension_numbers<[1], [0], [0], [1], [0, 0, 1, 1], [], []>} : vector<8x128xf32>, vector<128x128xf32>, vector<8x128xf32> -> vector<8x128xf32>
    %67 = arith.addf %65, %66 : vector<8x128xf32>
    %68 = arith.index_cast %63 : i32 to index
    %c0_39 = arith.constant 0 : index
    %69 = vector.load %arg8[%68, %c0_39] : memref<64x128xf32, #tpu.memory_space<vmem>>, vector<8x128xf32>
    tpu.vector_store %arg8[%68, %c0_39], %67 {strides = array<i32>} : memref<64x128xf32, #tpu.memory_space<vmem>>, vector<8x128xf32>,
    %c8_i32_40 = arith.constant 8 : i32
    %c0_41 = arith.constant 0 : index
    %c0_42 = arith.constant 0 : index
    %70 = vector.load %arg8[%c0_41, %c0_42] : memref<64x128xf32, #tpu.memory_space<vmem>>, vector<64x128xf32>
    %c0_43 = arith.constant 0 : index
    %c0_44 = arith.constant 0 : index
    %71 = vector.load %arg5[%c0_43, %c0_44] : memref<128x128xf32, #tpu.memory_space<vmem>>, vector<128x128xf32>
    %cst_45 = arith.constant dense<0.000000e+00> : vector<64x128xf32>
    %72 = tpu.matmul %70, %71, %cst_45 {dimension_numbers = #tpu.dot_dimension_numbers<[1], [0], [0], [1], [0, 0, 1, 1], [], []>} : vector<64x128xf32>, vector<128x128xf32>, vector<64x128xf32> -> vector<64x128xf32>
    %cst_46 = arith.constant dense<0xFF800000> : vector<64xf32>
    %73 = vector.multi_reduction <maximumf>, %72, %cst_46 [1] : vector<64x128xf32> to vector<64xf32>
    %74 = vector.shape_cast %73 : vector<64xf32> to vector<64x1xf32>
    %75 = vector.broadcast %74 : vector<64x1xf32> to vector<64x128xf32>
    %76 = arith.subf %72, %75 : vector<64x128xf32>
    %77 = math.exp %76 : vector<64x128xf32>
    %cst_47 = arith.constant dense<0.000000e+00> : vector<64xf32>
    %78 = vector.multi_reduction <add>, %77, %cst_47 [1] : vector<64x128xf32> to vector<64xf32>
    %79 = vector.shape_cast %78 : vector<64xf32> to vector<64x1xf32>
    %80 = math.log %79 : vector<64x1xf32>
    %81 = vector.broadcast %80 : vector<64x1xf32> to vector<64x128xf32>
    %82 = arith.subf %76, %81 : vector<64x128xf32>
    %c0_48 = arith.constant 0 : index
    %c0_49 = arith.constant 0 : index
    %83 = vector.load %arg6[%c0_48, %c0_49] : memref<64x128xf32, #tpu.memory_space<vmem>>, vector<64x128xf32>
    tpu.vector_store %arg6[%c0_48, %c0_49], %82 {strides = array<i32>} : memref<64x128xf32, #tpu.memory_space<vmem>>, vector<64x128xf32>,
    %c0_50 = arith.constant 0 : index
    %c0_51 = arith.constant 0 : index
    %84 = vector.load %arg7[%c0_50, %c0_51] : memref<8x128xf32, #tpu.memory_space<vmem>>, vector<8x128xf32>
    tpu.vector_store %arg7[%c0_50, %c0_51], %67 {strides = array<i32>} : memref<8x128xf32, #tpu.memory_space<vmem>>, vector<8x128xf32>,
    return
  }
  func.func @transform_0(%arg0: i32) -> (i32, i32) {
    %c0_i32 = arith.constant 0 : i32
    %c0_i32_0 = arith.constant 0 : i32
    %c0_i32_1 = arith.constant 0 : i32
    return %c0_i32, %c0_i32_0 : i32, i32
  }
  func.func @transform_1(%arg0: i32) -> (i32, i32) {
    %c0_i32 = arith.constant 0 : i32
    %c0_i32_0 = arith.constant 0 : i32
    %c0_i32_1 = arith.constant 0 : i32
    return %c0_i32, %c0_i32_0 : i32, i32
  }
  func.func @transform_2(%arg0: i32) -> (i32, i32) {
    %c0_i32 = arith.constant 0 : i32
    %c0_i32_0 = arith.constant 0 : i32
    %c0_i32_1 = arith.constant 0 : i32
    return %c0_i32, %c0_i32_0 : i32, i32
  }
  func.func @transform_3(%arg0: i32) -> (i32, i32) {
    %c0_i32 = arith.constant 0 : i32
    %c0_i32_0 = arith.constant 0 : i32
    %c0_i32_1 = arith.constant 0 : i32
    return %c0_i32, %c0_i32_0 : i32, i32
  }
  func.func @transform_4(%arg0: i32) -> (i32, i32) {
    %c0_i32 = arith.constant 0 : i32
    %c0_i32_0 = arith.constant 0 : i32
    %c0_i32_1 = arith.constant 0 : i32
    return %c0_i32, %c0_i32_0 : i32, i32
  }
  func.func @transform_5(%arg0: i32) -> (i32, i32) {
    %c0_i32 = arith.constant 0 : i32
    %c0_i32_0 = arith.constant 0 : i32
    %c0_i32_1 = arith.constant 0 : i32
    return %c0_i32, %c0_i32_0 : i32, i32
  }
  func.func @transform_6(%arg0: i32) -> (i32, i32) {
    %c0_i32 = arith.constant 0 : i32
    %c0_i32_0 = arith.constant 0 : i32
    %c0_i32_1 = arith.constant 0 : i32
    return %c0_i32, %c0_i32_0 : i32, i32
  }
}

</mosaic_0001>

<bundles_post_ra>
// kernel: tpu_custom_call.1
= control target key start
LH: loop header
LB: loop body
LE: loop exit
PB: predicated region body
PF: predicated region fallthrough
CT: control target
= control target key end

     0   :  { %12 = vsyncpa [#allocation4], 0  ;;  %s2284_s0 = inlined_call_operand.hbm [shape: f32[64,128], index: 0, kind: input, shape index: {}]   ;;  %s2285_s1 = inlined_call_operand.hbm [shape: f32[8,128], index: 1, kind: input, shape index: {}]   ;;  %s2286_s2 = inlined_call_operand.hbm [shape: f32[128,128], index: 2, kind: input, shape index: {}]   ;;  %s2287_s3 = inlined_call_operand.hbm [shape: f32[128,128], index: 3, kind: input, shape index: {}]   ;;  %s2288_s4 = inlined_call_operand.hbm [shape: f32[128,128], index: 4, kind: input, shape index: {}]   ;;  %s2289_s5 = inlined_call_operand.hbm [shape: f32[64,128], index: 5, kind: output, shape index: {0}]   ;;  %s2290_s6 = inlined_call_operand.hbm [shape: f32[8,128], index: 6, kind: output, shape index: {1}]  }
   0x1   :  { %13 = vsyncpa [#allocation7], 0 }
   0x2   :  { %14 = vsyncpa [#allocation10], 0 }
   0x3   :  { %15 = vsyncpa [#allocation5], 0 }
   0x4   :  { %16 = vsyncpa [#allocation14], 0  ;;  %s1831_s21 = smov [#allocation6]  }
   0x5   :  { %s35_s22 = sshll.u32 %s1831_s21, 4  ;;  %s36_s22 = int_to_ptr.vmem [resolvable:$true] %s35_s22 }
   0x6   :  { %s1689_s23 = scalar_lea.vmem %s36_s22, 128  ;;  %p1694_p1 = scmp.lt.s32.totalorder %s36_s22, %s36_s22 }
   0x7   :  { %p1690_p0 = scmp.ne.s32.totalorder %s36_s22, %s1689_s23  ;;  %p1695_p2 = scmp.lt.s32.totalorder %s1689_s23, %s1689_s23 }
   0x9   :  { %p1696_p3 = por %p1695_p2, %p1694_p1 }
   0xb   :  { %p1697_p4 = pnand %p1696_p3, %p1690_p0 }
   0xd   :  { %1700 = shalt.err (!%p1697_p4)
}
   0xe   :  { %38 = dma.hbm_to_vmem [thread:$0]  %s2285_s1, 128, %s36_s22, [#allocation7]  }
   0xf   :  { %s1832_s26 = smov [#allocation9]   ;;  %s1833_s28 = smov [#allocation3]  }
  0x10   :  { %s56_s27 = sshll.u32 %s1832_s26, 4  ;;  %s22_s29 = sshll.u32 %s1833_s28, 4  ;;  %s57_s27 = int_to_ptr.vmem [resolvable:$true] %s56_s27  ;;  %s23_s29 = int_to_ptr.vmem [resolvable:$true] %s22_s29 }
  0x11   :  { %s1709_s30 = scalar_lea.vmem %s57_s27, 2048  ;;  %p1714_p6 = scmp.lt.s32.totalorder %s57_s27, %s57_s27 }
  0x12   :  { %p1710_p5 = scmp.ne.s32.totalorder %s57_s27, %s1709_s30  ;;  %p1715_p7 = scmp.lt.s32.totalorder %s1709_s30, %s1709_s30 }
  0x14   :  { %p1716_p8 = por %p1715_p7, %p1714_p6 }
  0x16   :  { %p1717_p9 = pnand %p1716_p8, %p1710_p5 }
  0x18   :  { %1720 = shalt.err (!%p1717_p9)
}
  0x19   :  { %s1834_s7 = smov 128   ;;  %s1835_s8 = smov 8  }
  0x1a   :  { %62 = dma.hbm_to_vmem [thread:$0]  %s2287_s3, 2048, %s57_s27, [#allocation10], %s1834_s7, %s1834_s7, %s1835_s8  }
  0x1b   :  { %s1729_s1 = scalar_lea.vmem %s23_s29, 1024  ;;  %p1734_p11 = scmp.lt.s32.totalorder %s23_s29, %s23_s29 }
  0x1c   :  { %p1730_p10 = scmp.ne.s32.totalorder %s23_s29, %s1729_s1  ;;  %p1735_p12 = scmp.lt.s32.totalorder %s1729_s1, %s1729_s1 }
  0x1e   :  { %p1736_p13 = por %p1735_p12, %p1734_p11 }
  0x20   :  { %p1737_p0 = pnand %p1736_p13, %p1730_p10 }
  0x22   :  { %1740 = shalt.err (!%p1737_p0)
}
  0x23   :  { %28 = dma.hbm_to_vmem [thread:$0]  %s2284_s0, 1024, %s23_s29, [#allocation4], %s1834_s7, %s1834_s7, %s1835_s8  }
  0x24   :  { %s1836_s13 = smov [#allocation8]   ;;  %s1837_s15 = smov [#allocation11]  }
  0x25   :  { %s44_s14 = sshll.u32 %s1836_s13, 4  ;;  %s68_s3 = sshll.u32 %s1837_s15, 4  ;;  %s45_s14 = int_to_ptr.vmem [resolvable:$true] %s44_s14  ;;  %s69_s3 = int_to_ptr.vmem [resolvable:$true] %s68_s3 }
  0x26   :  { %s1749_s16 = scalar_lea.vmem %s45_s14, 2048  ;;  %p1754_p2 = scmp.lt.s32.totalorder %s45_s14, %s45_s14 }
  0x27   :  { %p1750_p1 = scmp.ne.s32.totalorder %s45_s14, %s1749_s16  ;;  %p1755_p3 = scmp.lt.s32.totalorder %s1749_s16, %s1749_s16 }
  0x29   :  { %p1756_p4 = por %p1755_p3, %p1754_p2 }
  0x2b   :  { %p1757_p5 = pnand %p1756_p4, %p1750_p1 }
  0x2d   :  { %1760 = shalt.err (!%p1757_p5)
}
  0x2e   :  { %50 = dma.hbm_to_vmem [thread:$0]  %s2286_s2, 2048, %s45_s14, [#allocation7], %s1834_s7, %s1834_s7, %s1835_s8  }
  0x2f   :  { %s1769_s0 = scalar_lea.vmem %s69_s3, 2048  ;;  %p1774_p7 = scmp.lt.s32.totalorder %s69_s3, %s69_s3 }
  0x30   :  { %p1770_p6 = scmp.ne.s32.totalorder %s69_s3, %s1769_s0  ;;  %p1775_p8 = scmp.lt.s32.totalorder %s1769_s0, %s1769_s0 }
  0x32   :  { %p1776_p9 = por %p1775_p8, %p1774_p7 }
  0x34   :  { %p1777_p10 = pnand %p1776_p9, %p1770_p6 }
  0x36   :  { %1780 = shalt.err (!%p1777_p10)
}
  0x37   :  { %74 = dma.hbm_to_vmem [thread:$0]  %s2288_s4, 2048, %s69_s3, [#allocation10], %s1834_s7, %s1834_s7, %s1835_s8  }
  0x38   :  { %1821 = dma.done.wait [#allocation4], 1024  }
  0x39   :  { %1822 = vsyncadd [#allocation4], 4294966272 }
  0x3a   :  { %1823 = dma.done.wait [#allocation7], 2176  }
  0x3b   :  { %1824 = vsyncadd [#allocation7], 4294965120 }
  0x3c   :  { %1825 = dma.done.wait [#allocation10], 4096  }
  0x3d   :  { %1826 = vsyncadd [#allocation10], 4294963200  ;;  %v1838_v0 = vmov 0.0   ;;  %vm1839_vm0 = vmmov 0   ;;  %v113_v1 = vld [vmem:[#allocation8 + $0x78] sm:$0xff]  ;;  %v112_v3 = vld [vmem:[#allocation8 + $0x70] sm:$0xff] }
  0x3e   :  { %1314 = vmatprep.subr.mxu1 %v1838_v0  ;;  %1346 = vmatprep.mubr.msk.f32.mxu1 %vm1839_vm0, %v1838_v0  ;;  %v1907_v2 = vld [vmem:[#allocation9 + $0x78] sm:$0xff]  ;;  %v1910_v4 = vld [vmem:[#allocation9 + $0x70] sm:$0xff]  ;;  %v111_v5 = vld [vmem:[#allocation8 + $0x68] sm:$0xff]  ;;  %s1840_s2 = smov [#allocation13]  }
  0x3f   :  { %1270 = vmatprep.subr.mxu0 %v113_v1  ;;  %1315 = vmatpush3.msra.mxu1 %v1907_v2  ;;  %v1913_v6 = vld [vmem:[#allocation9 + $0x68] sm:$0xff]  ;;  %v110_v7 = vld [vmem:[#allocation8 + $0x60] sm:$0xff]  ;;  %v109_v9 = vld [vmem:[#allocation8 + $0x58] sm:$0xff]  ;;  %s1071_s4 = sshll.u32 %s1840_s2, 4  ;;  %s1072_s4 = int_to_ptr.vmem [resolvable:$true] %s1071_s4 }
  0x40   :  { %1271 = vmatpush3.msra.mxu0 %v113_v1  ;;  %1316 = vmatprep.subr.mxu1 %v1838_v0  ;;  %v1917_v8 = vld [vmem:[#allocation9 + $0x60] sm:$0xff]  ;;  %v1921_v10 = vld [vmem:[#allocation9 + $0x58] sm:$0xff]  ;;  %v108_v11 = vld [vmem:[#allocation8 + $0x50] sm:$0xff]  ;;  %s1781_s21 = scalar_lea.vmem %s1072_s4, 128  ;;  %p1786_p12 = scmp.lt.s32.totalorder %s1072_s4, %s1072_s4 }
  0x41   :  { %1272 = vmatprep.subr.mxu0 %v112_v3  ;;  %1317 = vmatpush3.msra.mxu1 %v1910_v4  ;;  %v1925_v12 = vld [vmem:[#allocation9 + $0x50] sm:$0xff]  ;;  %v107_v13 = vld [vmem:[#allocation8 + $0x48] sm:$0xff]  ;;  %v106_v15 = vld [vmem:[#allocation8 + $0x40] sm:$0xff]  ;;  %p1782_p11 = scmp.ne.s32.totalorder %s1072_s4, %s1781_s21  ;;  %p1787_p13 = scmp.lt.s32.totalorder %s1781_s21, %s1781_s21 }
  0x42   :  { %1273 = vmatpush3.msra.mxu0 %v112_v3  ;;  %1318 = vmatprep.subr.mxu1 %v1838_v0  ;;  %v1929_v14 = vld [vmem:[#allocation9 + $0x48] sm:$0xff]  ;;  %v1933_v16 = vld [vmem:[#allocation9 + $0x40] sm:$0xff]  ;;  %v105_v17 = vld [vmem:[#allocation8 + $0x38] sm:$0xff] }
  0x43   :  { %1274 = vmatprep.subr.mxu0 %v111_v5  ;;  %1319 = vmatpush3.msra.mxu1 %v1913_v6  ;;  %v1937_v18 = vld [vmem:[#allocation9 + $0x38] sm:$0xff]  ;;  %v104_v19 = vld [vmem:[#allocation8 + $0x30] sm:$0xff]  ;;  %v103_v21 = vld [vmem:[#allocation8 + $0x28] sm:$0xff]  ;;  %p1788_p0 = por %p1787_p13, %p1786_p12 }
  0x44   :  { %1275 = vmatpush3.msra.mxu0 %v111_v5  ;;  %1320 = vmatprep.subr.mxu1 %v1838_v0  ;;  %v1941_v20 = vld [vmem:[#allocation9 + $0x30] sm:$0xff]  ;;  %v1945_v22 = vld [vmem:[#allocation9 + $0x28] sm:$0xff]  ;;  %v102_v23 = vld [vmem:[#allocation8 + $0x20] sm:$0xff] }
  0x45   :  { %1276 = vmatprep.subr.mxu0 %v110_v7  ;;  %1321 = vmatpush3.msra.mxu1 %v1917_v8  ;;  %v1949_v24 = vld [vmem:[#allocation9 + $0x20] sm:$0xff]  ;;  %v101_v25 = vld [vmem:[#allocation8 + $0x18] sm:$0xff]  ;;  %v100_v27 = vld [vmem:[#allocation8 + $0x10] sm:$0xff]  ;;  %p1789_p1 = pnand %p1788_p0, %p1782_p11 }
  0x46   :  { %1277 = vmatpush3.msra.mxu0 %v110_v7  ;;  %1322 = vmatprep.subr.mxu1 %v1838_v0  ;;  %v1953_v26 = vld [vmem:[#allocation9 + $0x18] sm:$0xff]  ;;  %v1957_v28 = vld [vmem:[#allocation9 + $0x10] sm:$0xff]  ;;  %v99_v29 = vld [vmem:[#allocation8 + $0x8] sm:$0xff] }
  0x47   :  { %1278 = vmatprep.subr.mxu0 %v109_v9  ;;  %1323 = vmatpush3.msra.mxu1 %v1921_v10  ;;  %v1961_v30 = vld [vmem:[#allocation9 + $0x8] sm:$0xff]  ;;  %v98_v31 = vld [vmem:[#allocation8] sm:$0xff]  ;;  %v90_v32 = vld [vmem:[#allocation3] sm:$0xff] }
  0x48   :  { %1279 = vmatpush3.msra.mxu0 %v109_v9  ;;  %1324 = vmatprep.subr.mxu1 %v1838_v0  ;;  %v1966_v33 = vld [vmem:[#allocation9] sm:$0xff]  ;;  %v243_v35 = vld [vmem:[#allocation6] sm:$0xff]  ;;  %v92_v36 = vld [vmem:[#allocation3 + $0x10] sm:$0xff] }
  0x49   :  { %1280 = vmatprep.subr.mxu0 %v108_v11  ;;  %1325 = vmatpush3.msra.mxu1 %v1925_v12  ;;  %v91_v34 = vld [vmem:[#allocation3 + $0x8] sm:$0xff]  ;;  %v93_v37 = vld [vmem:[#allocation3 + $0x18] sm:$0xff]  ;;  %v94_v38 = vld [vmem:[#allocation3 + $0x20] sm:$0xff] }
  0x4a   :  { %1281 = vmatpush3.msra.mxu0 %v108_v11  ;;  %1326 = vmatprep.subr.mxu1 %v1838_v0  ;;  %v95_v39 = vld [vmem:[#allocation3 + $0x28] sm:$0xff]  ;;  %v96_v40 = vld [vmem:[#allocation3 + $0x30] sm:$0xff]  ;;  %v97_v41 = vld [vmem:[#allocation3 + $0x38] sm:$0xff] }
  0x4b   :  { %1282 = vmatprep.subr.mxu0 %v107_v13  ;;  %1327 = vmatpush3.msra.mxu1 %v1929_v14  ;;  %v856_v7 = vld [vmem:[#allocation11 + $0x68] sm:$0xff]  ;;  %v853_v9 = vld [vmem:[#allocation11 + $0x50] sm:$0xff]  ;;  %v851_v11 = vld [vmem:[#allocation11 + $0x40] sm:$0xff] }
  0x4c   :  { %1283 = vmatpush3.msra.mxu0 %v107_v13  ;;  %1328 = vmatprep.subr.mxu1 %v1838_v0  ;;  %v849_v13 = vld [vmem:[#allocation11 + $0x30] sm:$0xff] }
  0x4d   :  { %1284 = vmatprep.subr.mxu0 %v106_v15  ;;  %1329 = vmatpush3.msra.mxu1 %v1933_v16 }
  0x4e   :  { %1285 = vmatpush3.msra.mxu0 %v106_v15  ;;  %1330 = vmatprep.subr.mxu1 %v1838_v0  ;;  %v847_v15 = vld [vmem:[#allocation11 + $0x20] sm:$0xff] }
  0x4f   :  { %1286 = vmatprep.subr.mxu0 %v105_v17  ;;  %1331 = vmatpush3.msra.mxu1 %v1937_v18 }
  0x50   :  { %1287 = vmatpush3.msra.mxu0 %v105_v17  ;;  %1332 = vmatprep.subr.mxu1 %v1838_v0  ;;  %v845_v17 = vld [vmem:[#allocation11 + $0x10] sm:$0xff] }
  0x51   :  { %1288 = vmatprep.subr.mxu0 %v104_v19  ;;  %1333 = vmatpush3.msra.mxu1 %v1941_v20 }
  0x52   :  { %1289 = vmatpush3.msra.mxu0 %v104_v19  ;;  %1334 = vmatprep.subr.mxu1 %v1838_v0  ;;  %v843_v19 = vld [vmem:[#allocation11] sm:$0xff] }
  0x53   :  { %1290 = vmatprep.subr.mxu0 %v103_v21  ;;  %1335 = vmatpush3.msra.mxu1 %v1945_v22 }
  0x54   :  { %1291 = vmatpush3.msra.mxu0 %v103_v21  ;;  %1336 = vmatprep.subr.mxu1 %v1838_v0 }
  0x55   :  { %1292 = vmatprep.subr.mxu0 %v102_v23  ;;  %1337 = vmatpush3.msra.mxu1 %v1949_v24 }
  0x56   :  { %1293 = vmatpush3.msra.mxu0 %v102_v23  ;;  %1338 = vmatprep.subr.mxu1 %v1838_v0 }
  0x57   :  { %1294 = vmatprep.subr.mxu0 %v101_v25  ;;  %1339 = vmatpush3.msra.mxu1 %v1953_v26 }
  0x58   :  { %1295 = vmatpush3.msra.mxu0 %v101_v25  ;;  %1340 = vmatprep.subr.mxu1 %v1838_v0 }
  0x59   :  { %1296 = vmatprep.subr.mxu0 %v100_v27  ;;  %1341 = vmatpush3.msra.mxu1 %v1957_v28 }
  0x5a   :  { %1297 = vmatpush3.msra.mxu0 %v100_v27  ;;  %1342 = vmatprep.subr.mxu1 %v1838_v0 }
  0x5b   :  { %1298 = vmatprep.subr.mxu0 %v99_v29  ;;  %1343 = vmatpush3.msra.mxu1 %v1961_v30 }
  0x5c   :  { %1299 = vmatpush3.msra.mxu0 %v99_v29  ;;  %1344 = vmatprep.subr.mxu1 %v1838_v0 }
  0x5d   :  { %1300 = vmatprep.subr.mxu0 %v98_v31  ;;  %1302 = vmatprep.mubr.f32.mxu0 %v90_v32 }
  0x5e   :  { %1301 = vmatpush3.msra.mxu0 %v98_v31  ;;  %1345 = vmatpush3.msra.mxu1 %v1966_v33 }
  0x5f   :  { %1303 = vmatmul.mubr.f32.vlgmr.msra.gmra.mxu0 %v91_v34  ;;  %1347 = vmatmul.mubr.f32.vlgmr.msra.gmra.mxu1 %v243_v35 }
  0x60   :  { %1349 = vmatprep.subr.mxu0 %v1838_v0  ;;  %1305 = vmatprep.mubr.f32.mxu0 %v92_v36 }
  0x61   :  { %1350 = vmatpush3.msra.mxu0 %v1907_v2  ;;  %1384 = vmatprep.subr.mxu1 %v1838_v0 }
  0x62   :  { %1351 = vmatprep.subr.mxu0 %v1838_v0  ;;  %1385 = vmatpush3.msra.mxu1 %v1907_v2 }
  0x63   :  { %1352 = vmatpush3.msra.mxu0 %v1910_v4  ;;  %1386 = vmatprep.subr.mxu1 %v1838_v0 }
  0x64   :  { %1353 = vmatprep.subr.mxu0 %v1838_v0  ;;  %1306 = vmatmul.mubr.f32.gmra.mxu0 %v93_v37 }
  0x65   :  { %1354 = vmatpush3.msra.mxu0 %v1913_v6  ;;  %1308 = vmatprep.mubr.f32.mxu0 %v94_v38 }
  0x66   :  { %1355 = vmatprep.subr.mxu0 %v1838_v0  ;;  %1387 = vmatpush3.msra.mxu1 %v1910_v4 }
  0x67   :  { %1356 = vmatpush3.msra.mxu0 %v1917_v8  ;;  %1388 = vmatprep.subr.mxu1 %v1838_v0 }
  0x68   :  { %1357 = vmatprep.subr.mxu0 %v1838_v0  ;;  %1309 = vmatmul.mubr.f32.gmra.mxu0 %v95_v39 }
  0x69   :  { %1358 = vmatpush3.msra.mxu0 %v1921_v10  ;;  %1311 = vmatprep.mubr.f32.mxu0 %v96_v40 }
  0x6a   :  { %1359 = vmatprep.subr.mxu0 %v1838_v0  ;;  %1389 = vmatpush3.msra.mxu1 %v1913_v6 }
  0x6b   :  { %1360 = vmatpush3.msra.mxu0 %v1925_v12  ;;  %1390 = vmatprep.subr.mxu1 %v1838_v0 }
  0x6c   :  { %1361 = vmatprep.subr.mxu0 %v1838_v0  ;;  %1312 = vmatmul.mubr.f32.gmra.mxu0 %v97_v41 }
  0x6d   :  { %1362 = vmatpush3.msra.mxu0 %v1929_v14  ;;  %1381 = vmatprep.mubr.msk.f32.mxu0 %vm1839_vm0, %v1838_v0 }
  0x6e   :  { %1363 = vmatprep.subr.mxu0 %v1838_v0  ;;  %1391 = vmatpush3.msra.mxu1 %v1917_v8 }
  0x6f   :  { %1364 = vmatpush3.msra.mxu0 %v1933_v16  ;;  %1392 = vmatprep.subr.mxu1 %v1838_v0 }
  0x70   :  { %1365 = vmatprep.subr.mxu0 %v1838_v0  ;;  %1393 = vmatpush3.msra.mxu1 %v1921_v10 }
  0x71   :  { %1366 = vmatpush3.msra.mxu0 %v1937_v18  ;;  %1394 = vmatprep.subr.mxu1 %v1838_v0 }
  0x72   :  { %1367 = vmatprep.subr.mxu0 %v1838_v0  ;;  %1395 = vmatpush3.msra.mxu1 %v1925_v12 }
  0x73   :  { %1368 = vmatpush3.msra.mxu0 %v1941_v20  ;;  %1396 = vmatprep.subr.mxu1 %v1838_v0 }
  0x74   :  { %1369 = vmatprep.subr.mxu0 %v1838_v0  ;;  %1397 = vmatpush3.msra.mxu1 %v1929_v14 }
  0x75   :  { %1370 = vmatpush3.msra.mxu0 %v1945_v22  ;;  %1398 = vmatprep.subr.mxu1 %v1838_v0 }
  0x76   :  { %1371 = vmatprep.subr.mxu0 %v1838_v0  ;;  %1399 = vmatpush3.msra.mxu1 %v1933_v16 }
  0x77   :  { %1372 = vmatpush3.msra.mxu0 %v1949_v24  ;;  %1400 = vmatprep.subr.mxu1 %v1838_v0 }
  0x78   :  { %1373 = vmatprep.subr.mxu0 %v1838_v0  ;;  %1401 = vmatpush3.msra.mxu1 %v1937_v18 }
  0x79   :  { %1374 = vmatpush3.msra.mxu0 %v1953_v26  ;;  %1402 = vmatprep.subr.mxu1 %v1838_v0 }
  0x7a   :  { %1375 = vmatprep.subr.mxu0 %v1838_v0  ;;  %1403 = vmatpush3.msra.mxu1 %v1941_v20 }
  0x7b   :  { %1376 = vmatpush3.msra.mxu0 %v1957_v28  ;;  %1404 = vmatprep.subr.mxu1 %v1838_v0 }
  0x7c   :  { %1377 = vmatprep.subr.mxu0 %v1838_v0  ;;  %1405 = vmatpush3.msra.mxu1 %v1945_v22 }
  0x7d   :  { %1378 = vmatpush3.msra.mxu0 %v1961_v30  ;;  %1406 = vmatprep.subr.mxu1 %v1838_v0 }
  0x7e   :  { %1379 = vmatprep.subr.mxu0 %v1838_v0  ;;  %1407 = vmatpush3.msra.mxu1 %v1949_v24 }
  0x7f   :  { %1380 = vmatpush3.msra.mxu0 %v1966_v33  ;;  %1408 = vmatprep.subr.mxu1 %v1838_v0 }
  0x80   :  { %1409 = vmatpush3.msra.mxu1 %v1953_v26  ;;  %1416 = vmatprep.mubr.msk.f32.mxu1 %vm1839_vm0, %v1838_v0 }
  0x81   :  { %1410 = vmatprep.subr.mxu1 %v1838_v0  ;;  %1419 = vmatprep.subr.mxu0 %v1838_v0 }
  0x82   :  { %1411 = vmatpush3.msra.mxu1 %v1957_v28 }
  0x83   :  { %1412 = vmatprep.subr.mxu1 %v1838_v0 }
  0x84   :  { %1413 = vmatpush3.msra.mxu1 %v1961_v30 }
  0x85   :  { %1414 = vmatprep.subr.mxu1 %v1838_v0 }
  0x86   :  { %1415 = vmatpush3.msra.mxu1 %v1966_v33 }
  0x87   :  { %1454 = vmatprep.subr.mxu1 %v1838_v0 }
 0x11f   :  { %v1304_v42 = vpop.f32.mrf.mxu0  ;;  %v311_v43 = vpop.f32.mrf.mxu1 }
 0x121   :  { %v180_v44 = vpop.f32.mrf.mxu0  ;;  %v1348_v45 = vpop.f32.mrf.mxu1 }
 0x122   :  { %v2040_v46 = vadd.f32 %v311_v43, %v180_v44 }
 0x124   :  { %1382 = vmatmul.mubr.f32.vlgmr.msra.gmra.mxu0 %v2040_v46  ;;  %v2077_v47 = vpop.f32.mrf.mxu0 }
 0x125   :  { %1420 = vmatpush3.msra.mxu0 %v1907_v2  ;;  %1451 = vmatprep.mubr.msk.f32.mxu0 %vm1839_vm0, %v1838_v0 }
 0x126   :  { %1421 = vmatprep.subr.mxu0 %v1838_v0  ;;  %v190_v48 = vpop.f32.mrf.mxu0 }
 0x127   :  { %1422 = vmatpush3.msra.mxu0 %v1910_v4 }
 0x128   :  { %1423 = vmatprep.subr.mxu0 %v1838_v0  ;;  %v2079_v49 = vpop.f32.mrf.mxu0 }
 0x129   :  { %1424 = vmatpush3.msra.mxu0 %v1913_v6 }
 0x12a   :  { %1425 = vmatprep.subr.mxu0 %v1838_v0  ;;  %v2081_v50 = vpop.f32.mrf.mxu0 }
 0x12b   :  { %1426 = vmatpush3.msra.mxu0 %v1917_v8 }
 0x12c   :  { %1427 = vmatprep.subr.mxu0 %v1838_v0  ;;  %v2083_v51 = vpop.f32.mrf.mxu0 }
 0x12d   :  { %1428 = vmatpush3.msra.mxu0 %v1921_v10 }
 0x12e   :  { %1429 = vmatprep.subr.mxu0 %v1838_v0  ;;  %v2085_v52 = vpop.f32.mrf.mxu0 }
 0x12f   :  { %1430 = vmatpush3.msra.mxu0 %v1925_v12 }
 0x130   :  { %1431 = vmatprep.subr.mxu0 %v1838_v0 }
 0x131   :  { %1432 = vmatpush3.msra.mxu0 %v1929_v14 }
 0x132   :  { %1433 = vmatprep.subr.mxu0 %v1838_v0 }
 0x133   :  { %1434 = vmatpush3.msra.mxu0 %v1933_v16 }
 0x134   :  { %1435 = vmatprep.subr.mxu0 %v1838_v0 }
 0x135   :  { %1436 = vmatpush3.msra.mxu0 %v1937_v18 }
 0x136   :  { %1437 = vmatprep.subr.mxu0 %v1838_v0 }
 0x137   :  { %1438 = vmatpush3.msra.mxu0 %v1941_v20 }
 0x138   :  { %1439 = vmatprep.subr.mxu0 %v1838_v0 }
 0x139   :  { %1440 = vmatpush3.msra.mxu0 %v1945_v22 }
 0x13a   :  { %1441 = vmatprep.subr.mxu0 %v1838_v0 }
 0x13b   :  { %1442 = vmatpush3.msra.mxu0 %v1949_v24 }
 0x13c   :  { %1443 = vmatprep.subr.mxu0 %v1838_v0 }
 0x13d   :  { %1444 = vmatpush3.msra.mxu0 %v1953_v26 }
 0x13e   :  { %1445 = vmatprep.subr.mxu0 %v1838_v0 }
 0x13f   :  { %1446 = vmatpush3.msra.mxu0 %v1957_v28 }
 0x140   :  { %1447 = vmatprep.subr.mxu0 %v1838_v0 }
 0x141   :  { %1448 = vmatpush3.msra.mxu0 %v1961_v30 }
 0x142   :  { %1449 = vmatprep.subr.mxu0 %v1838_v0 }
 0x143   :  { %1450 = vmatpush3.msra.mxu0 %v1966_v33 }
 0x144   :  { %1489 = vmatprep.subr.mxu0 %v1838_v0 }
 0x1e4   :  { %v385_v53 = vpop.f32.mrf.mxu0 }
 0x1e5   :  { %v2087_v54 = vadd.f32 %v1304_v42, %v385_v53 }
 0x1e6   :  { %v1383_v55 = vpop.f32.mrf.mxu0 }
 0x1e7   :  { %1417 = vmatmul.mubr.f32.vlgmr.msra.gmra.mxu1 %v2087_v54 }
 0x1e8   :  { %1455 = vmatpush3.msra.mxu1 %v1907_v2  ;;  %1486 = vmatprep.mubr.msk.f32.mxu1 %vm1839_vm0, %v1838_v0 }
 0x1e9   :  { %1456 = vmatprep.subr.mxu1 %v1838_v0 }
 0x1ea   :  { %1457 = vmatpush3.msra.mxu1 %v1910_v4 }
 0x1eb   :  { %1458 = vmatprep.subr.mxu1 %v1838_v0 }
 0x1ec   :  { %1459 = vmatpush3.msra.mxu1 %v1913_v6 }
 0x1ed   :  { %1460 = vmatprep.subr.mxu1 %v1838_v0 }
 0x1ee   :  { %1461 = vmatpush3.msra.mxu1 %v1917_v8 }
 0x1ef   :  { %1462 = vmatprep.subr.mxu1 %v1838_v0 }
 0x1f0   :  { %1463 = vmatpush3.msra.mxu1 %v1921_v10 }
 0x1f1   :  { %1464 = vmatprep.subr.mxu1 %v1838_v0 }
 0x1f2   :  { %1465 = vmatpush3.msra.mxu1 %v1925_v12 }
 0x1f3   :  { %1466 = vmatprep.subr.mxu1 %v1838_v0 }
 0x1f4   :  { %1467 = vmatpush3.msra.mxu1 %v1929_v14 }
 0x1f5   :  { %1468 = vmatprep.subr.mxu1 %v1838_v0 }
 0x1f6   :  { %1469 = vmatpush3.msra.mxu1 %v1933_v16 }
 0x1f7   :  { %1470 = vmatprep.subr.mxu1 %v1838_v0 }
 0x1f8   :  { %1471 = vmatpush3.msra.mxu1 %v1937_v18 }
 0x1f9   :  { %1472 = vmatprep.subr.mxu1 %v1838_v0 }
 0x1fa   :  { %1473 = vmatpush3.msra.mxu1 %v1941_v20 }
 0x1fb   :  { %1474 = vmatprep.subr.mxu1 %v1838_v0 }
 0x1fc   :  { %1475 = vmatpush3.msra.mxu1 %v1945_v22 }
 0x1fd   :  { %1476 = vmatprep.subr.mxu1 %v1838_v0 }
 0x1fe   :  { %1477 = vmatpush3.msra.mxu1 %v1949_v24 }
 0x1ff   :  { %1478 = vmatprep.subr.mxu1 %v1838_v0 }
 0x200   :  { %1479 = vmatpush3.msra.mxu1 %v1953_v26 }
 0x201   :  { %1480 = vmatprep.subr.mxu1 %v1838_v0 }
 0x202   :  { %1481 = vmatpush3.msra.mxu1 %v1957_v28 }
 0x203   :  { %1482 = vmatprep.subr.mxu1 %v1838_v0 }
 0x204   :  { %1483 = vmatpush3.msra.mxu1 %v1961_v30 }
 0x205   :  { %1484 = vmatprep.subr.mxu1 %v1838_v0 }
 0x206   :  { %1485 = vmatpush3.msra.mxu1 %v1966_v33 }
 0x207   :  { %1524 = vmatprep.subr.mxu1 %v1838_v0 }
 0x2a7   :  { %v459_v56 = vpop.f32.mrf.mxu1 }
 0x2a8   :  { %v2124_v57 = vadd.f32 %v459_v56, %v190_v48 }
 0x2a9   :  { %v1418_v58 = vpop.f32.mrf.mxu1 }
 0x2aa   :  { %1452 = vmatmul.mubr.f32.vlgmr.msra.gmra.mxu0 %v2124_v57 }
 0x2ab   :  { %1490 = vmatpush3.msra.mxu0 %v1907_v2  ;;  %1521 = vmatprep.mubr.msk.f32.mxu0 %vm1839_vm0, %v1838_v0 }
 0x2ac   :  { %1491 = vmatprep.subr.mxu0 %v1838_v0 }
 0x2ad   :  { %1492 = vmatpush3.msra.mxu0 %v1910_v4 }
 0x2ae   :  { %1493 = vmatprep.subr.mxu0 %v1838_v0 }
 0x2af   :  { %1494 = vmatpush3.msra.mxu0 %v1913_v6 }
 0x2b0   :  { %1495 = vmatprep.subr.mxu0 %v1838_v0 }
 0x2b1   :  { %1496 = vmatpush3.msra.mxu0 %v1917_v8 }
 0x2b2   :  { %1497 = vmatprep.subr.mxu0 %v1838_v0 }
 0x2b3   :  { %1498 = vmatpush3.msra.mxu0 %v1921_v10 }
 0x2b4   :  { %1499 = vmatprep.subr.mxu0 %v1838_v0 }
 0x2b5   :  { %1500 = vmatpush3.msra.mxu0 %v1925_v12 }
 0x2b6   :  { %1501 = vmatprep.subr.mxu0 %v1838_v0 }
 0x2b7   :  { %1502 = vmatpush3.msra.mxu0 %v1929_v14 }
 0x2b8   :  { %1503 = vmatprep.subr.mxu0 %v1838_v0 }
 0x2b9   :  { %1504 = vmatpush3.msra.mxu0 %v1933_v16 }
 0x2ba   :  { %1505 = vmatprep.subr.mxu0 %v1838_v0 }
 0x2bb   :  { %1506 = vmatpush3.msra.mxu0 %v1937_v18 }
 0x2bc   :  { %1507 = vmatprep.subr.mxu0 %v1838_v0 }
 0x2bd   :  { %1508 = vmatpush3.msra.mxu0 %v1941_v20 }
 0x2be   :  { %1509 = vmatprep.subr.mxu0 %v1838_v0 }
 0x2bf   :  { %1510 = vmatpush3.msra.mxu0 %v1945_v22 }
 0x2c0   :  { %1511 = vmatprep.subr.mxu0 %v1838_v0 }
 0x2c1   :  { %1512 = vmatpush3.msra.mxu0 %v1949_v24 }
 0x2c2   :  { %1513 = vmatprep.subr.mxu0 %v1838_v0 }
 0x2c3   :  { %1514 = vmatpush3.msra.mxu0 %v1953_v26 }
 0x2c4   :  { %1515 = vmatprep.subr.mxu0 %v1838_v0 }
 0x2c5   :  { %1516 = vmatpush3.msra.mxu0 %v1957_v28 }
 0x2c6   :  { %1517 = vmatprep.subr.mxu0 %v1838_v0 }
 0x2c7   :  { %1518 = vmatpush3.msra.mxu0 %v1961_v30 }
 0x2c8   :  { %1519 = vmatprep.subr.mxu0 %v1838_v0 }
 0x2c9   :  { %1520 = vmatpush3.msra.mxu0 %v1966_v33 }
 0x2ca   :  { %1559 = vmatprep.subr.mxu0 %v1838_v0 }
 0x36a   :  { %v533_v59 = vpop.f32.mrf.mxu0 }
 0x36b   :  { %v2162_v60 = vadd.f32 %v2077_v47, %v533_v59 }
 0x36c   :  { %v1453_v61 = vpop.f32.mrf.mxu0 }
 0x36d   :  { %1487 = vmatmul.mubr.f32.vlgmr.msra.gmra.mxu1 %v2162_v60 }
 0x36e   :  { %1525 = vmatpush3.msra.mxu1 %v1907_v2  ;;  %1556 = vmatprep.mubr.msk.f32.mxu1 %vm1839_vm0, %v1838_v0 }
 0x36f   :  { %1526 = vmatprep.subr.mxu1 %v1838_v0 }
 0x370   :  { %1527 = vmatpush3.msra.mxu1 %v1910_v4 }
 0x371   :  { %1528 = vmatprep.subr.mxu1 %v1838_v0 }
 0x372   :  { %1529 = vmatpush3.msra.mxu1 %v1913_v6 }
 0x373   :  { %1530 = vmatprep.subr.mxu1 %v1838_v0 }
 0x374   :  { %1531 = vmatpush3.msra.mxu1 %v1917_v8 }
 0x375   :  { %1532 = vmatprep.subr.mxu1 %v1838_v0 }
 0x376   :  { %1533 = vmatpush3.msra.mxu1 %v1921_v10 }
 0x377   :  { %1534 = vmatprep.subr.mxu1 %v1838_v0 }
 0x378   :  { %1535 = vmatpush3.msra.mxu1 %v1925_v12 }
 0x379   :  { %1536 = vmatprep.subr.mxu1 %v1838_v0 }
 0x37a   :  { %1537 = vmatpush3.msra.mxu1 %v1929_v14 }
 0x37b   :  { %1538 = vmatprep.subr.mxu1 %v1838_v0 }
 0x37c   :  { %1539 = vmatpush3.msra.mxu1 %v1933_v16 }
 0x37d   :  { %1540 = vmatprep.subr.mxu1 %v1838_v0 }
 0x37e   :  { %1541 = vmatpush3.msra.mxu1 %v1937_v18 }
 0x37f   :  { %1542 = vmatprep.subr.mxu1 %v1838_v0 }
 0x380   :  { %1543 = vmatpush3.msra.mxu1 %v1941_v20 }
 0x381   :  { %1544 = vmatprep.subr.mxu1 %v1838_v0 }
 0x382   :  { %1545 = vmatpush3.msra.mxu1 %v1945_v22 }
 0x383   :  { %1546 = vmatprep.subr.mxu1 %v1838_v0 }
 0x384   :  { %1547 = vmatpush3.msra.mxu1 %v1949_v24 }
 0x385   :  { %1548 = vmatprep.subr.mxu1 %v1838_v0 }
 0x386   :  { %1549 = vmatpush3.msra.mxu1 %v1953_v26 }
 0x387   :  { %1550 = vmatprep.subr.mxu1 %v1838_v0 }
 0x388   :  { %1551 = vmatpush3.msra.mxu1 %v1957_v28 }
 0x389   :  { %1552 = vmatprep.subr.mxu1 %v1838_v0 }
 0x38a   :  { %1553 = vmatpush3.msra.mxu1 %v1961_v30 }
 0x38b   :  { %1554 = vmatprep.subr.mxu1 %v1838_v0 }
 0x38c   :  { %1555 = vmatpush3.msra.mxu1 %v1966_v33 }
 0x42d   :  { %v607_v62 = vpop.f32.mrf.mxu1 }
 0x42e   :  { %v2199_v63 = vadd.f32 %v607_v62, %v2081_v50 }
 0x42f   :  { %v1488_v1 = vpop.f32.mrf.mxu1 }
 0x430   :  { %1522 = vmatmul.mubr.f32.vlgmr.msra.gmra.mxu0 %v2199_v63 }
 0x431   :  { %1560 = vmatpush3.msra.mxu0 %v1907_v2  ;;  %1591 = vmatprep.mubr.msk.f32.mxu0 %vm1839_vm0, %v1838_v0  ;;  %v858_v2 = vld [vmem:[#allocation11 + $0x78] sm:$0xff] }
 0x432   :  { %1561 = vmatprep.subr.mxu0 %v1838_v0  ;;  %1594 = vmatprep.subr.mxu1 %v858_v2 }
 0x433   :  { %1562 = vmatpush3.msra.mxu0 %v1910_v4 }
 0x434   :  { %1563 = vmatprep.subr.mxu0 %v1838_v0 }
 0x435   :  { %1564 = vmatpush3.msra.mxu0 %v1913_v6  ;;  %v857_v6 = vld [vmem:[#allocation11 + $0x70] sm:$0xff] }
 0x436   :  { %1565 = vmatprep.subr.mxu0 %v1838_v0 }
 0x437   :  { %1566 = vmatpush3.msra.mxu0 %v1917_v8  ;;  %v855_v8 = vld [vmem:[#allocation11 + $0x60] sm:$0xff] }
 0x438   :  { %1567 = vmatprep.subr.mxu0 %v1838_v0 }
 0x439   :  { %1568 = vmatpush3.msra.mxu0 %v1921_v10  ;;  %v852_v10 = vld [vmem:[#allocation11 + $0x48] sm:$0xff] }
 0x43a   :  { %1569 = vmatprep.subr.mxu0 %v1838_v0 }
 0x43b   :  { %1570 = vmatpush3.msra.mxu0 %v1925_v12  ;;  %v850_v12 = vld [vmem:[#allocation11 + $0x38] sm:$0xff] }
 0x43c   :  { %1571 = vmatprep.subr.mxu0 %v1838_v0 }
 0x43d   :  { %1572 = vmatpush3.msra.mxu0 %v1929_v14  ;;  %v848_v14 = vld [vmem:[#allocation11 + $0x28] sm:$0xff] }
 0x43e   :  { %1573 = vmatprep.subr.mxu0 %v1838_v0 }
 0x43f   :  { %1574 = vmatpush3.msra.mxu0 %v1933_v16  ;;  %v846_v16 = vld [vmem:[#allocation11 + $0x18] sm:$0xff] }
 0x440   :  { %1575 = vmatprep.subr.mxu0 %v1838_v0 }
 0x441   :  { %1576 = vmatpush3.msra.mxu0 %v1937_v18  ;;  %v844_v18 = vld [vmem:[#allocation11 + $0x8] sm:$0xff] }
 0x442   :  { %1577 = vmatprep.subr.mxu0 %v1838_v0 }
 0x443   :  { %1578 = vmatpush3.msra.mxu0 %v1941_v20 }
 0x444   :  { %1579 = vmatprep.subr.mxu0 %v1838_v0 }
 0x445   :  { %1580 = vmatpush3.msra.mxu0 %v1945_v22 }
 0x446   :  { %1581 = vmatprep.subr.mxu0 %v1838_v0 }
 0x447   :  { %1582 = vmatpush3.msra.mxu0 %v1949_v24 }
 0x448   :  { %1583 = vmatprep.subr.mxu0 %v1838_v0 }
 0x449   :  { %1584 = vmatpush3.msra.mxu0 %v1953_v26 }
 0x44a   :  { %1585 = vmatprep.subr.mxu0 %v1838_v0 }
 0x44b   :  { %1586 = vmatpush3.msra.mxu0 %v1957_v28 }
 0x44c   :  { %1587 = vmatprep.subr.mxu0 %v1838_v0 }
 0x44d   :  { %1588 = vmatpush3.msra.mxu0 %v1961_v30 }
 0x44e   :  { %1589 = vmatprep.subr.mxu0 %v1838_v0  ;;  %v854_v0 = vld [vmem:[#allocation11 + $0x58] sm:$0xff] }
 0x44f   :  { %1590 = vmatpush3.msra.mxu0 %v1966_v33 }
 0x4f0   :  { %v681_v3 = vpop.f32.mrf.mxu0 }
 0x4f1   :  { %v685_v4 = vadd.f32 %v2079_v49, %v681_v3 }
 0x4f2   :  { %v1523_v5 = vpop.f32.mrf.mxu0 }
 0x4f3   :  { %1557 = vmatmul.mubr.f32.vlgmr.msra.gmra.mxu1 %v685_v4 }
 0x4f4   :  { %1595 = vmatpush3.msra.mxu1 %v858_v2  ;;  %1626 = vmatprep.mubr.f32.mxu1 %v2040_v46 }
 0x4f5   :  { %1596 = vmatprep.subr.mxu1 %v857_v6 }
 0x4f6   :  { %1597 = vmatpush3.msra.mxu1 %v857_v6 }
 0x4f7   :  { %1598 = vmatprep.subr.mxu1 %v856_v7 }
 0x4f8   :  { %1599 = vmatpush3.msra.mxu1 %v856_v7 }
 0x4f9   :  { %1600 = vmatprep.subr.mxu1 %v855_v8 }
 0x4fa   :  { %1601 = vmatpush3.msra.mxu1 %v855_v8 }
 0x4fb   :  { %1602 = vmatprep.subr.mxu1 %v854_v0 }
 0x4fc   :  { %1603 = vmatpush3.msra.mxu1 %v854_v0 }
 0x4fd   :  { %1604 = vmatprep.subr.mxu1 %v853_v9 }
 0x4fe   :  { %1605 = vmatpush3.msra.mxu1 %v853_v9 }
 0x4ff   :  { %1606 = vmatprep.subr.mxu1 %v852_v10 }
 0x500   :  { %1607 = vmatpush3.msra.mxu1 %v852_v10 }
 0x501   :  { %1608 = vmatprep.subr.mxu1 %v851_v11 }
 0x502   :  { %1609 = vmatpush3.msra.mxu1 %v851_v11 }
 0x503   :  { %1610 = vmatprep.subr.mxu1 %v850_v12 }
 0x504   :  { %1611 = vmatpush3.msra.mxu1 %v850_v12 }
 0x505   :  { %1612 = vmatprep.subr.mxu1 %v849_v13 }
 0x506   :  { %1613 = vmatpush3.msra.mxu1 %v849_v13 }
 0x507   :  { %1614 = vmatprep.subr.mxu1 %v848_v14 }
 0x508   :  { %1615 = vmatpush3.msra.mxu1 %v848_v14 }
 0x509   :  { %1616 = vmatprep.subr.mxu1 %v847_v15 }
 0x50a   :  { %1617 = vmatpush3.msra.mxu1 %v847_v15 }
 0x50b   :  { %1618 = vmatprep.subr.mxu1 %v846_v16 }
 0x50c   :  { %1619 = vmatpush3.msra.mxu1 %v846_v16 }
 0x50d   :  { %1620 = vmatprep.subr.mxu1 %v845_v17 }
 0x50e   :  { %1621 = vmatpush3.msra.mxu1 %v845_v17 }
 0x50f   :  { %1622 = vmatprep.subr.mxu1 %v844_v18 }
 0x510   :  { %1623 = vmatpush3.msra.mxu1 %v844_v18 }
 0x511   :  { %1624 = vmatprep.subr.mxu1 %v843_v19 }
 0x512   :  { %1625 = vmatpush3.msra.mxu1 %v843_v19 }
 0x513   :  { %1627 = vmatmul.mubr.f32.vlgmr.msra.gmra.mxu1 %v2087_v54 }
 0x514   :  { %1629 = vmatprep.mubr.f32.mxu1 %v2124_v57 }
 0x517   :  { %1630 = vmatmul.mubr.f32.gmra.mxu1 %v2162_v60 }
 0x518   :  { %1632 = vmatprep.mubr.f32.mxu1 %v2199_v63 }
 0x51b   :  { %1633 = vmatmul.mubr.f32.gmra.mxu1 %v685_v4 }
 0x5b3   :  { %v755_v20 = vpop.f32.mrf.mxu1 }
 0x5b4   :  { %v759_v21 = vadd.f32 %v755_v20, %v2085_v52 }
 0x5b5   :  { %v1558_v22 = vpop.f32.mrf.mxu1 }
 0x5b6   :  { %1592 = vmatmul.mubr.f32.vlgmr.msra.gmra.mxu0 %v759_v21  ;;  %1635 = vmatprep.mubr.f32.mxu1 %v759_v21 }
 0x5d3   :  { %v1628_v23 = vpop.f32.mrf.mxu1 }
 0x5d4   :  { %966 = vmax.xlane.f32.xlu0 %v1628_v23 }
 0x5d5   :  { %v925_v24 = vpop.f32.mrf.mxu1 }
 0x5d7   :  { %v1631_v25 = vpop.f32.mrf.mxu1 }
 0x5d8   :  { %964 = vmax.xlane.f32.xlu0 %v925_v24  ;;  %970 = vmax.xlane.f32.xlu1 %v1631_v25 }
 0x5d9   :  { %v935_v26 = vpop.f32.mrf.mxu1 }
 0x5db   :  { %v1634_v27 = vpop.f32.mrf.mxu1 }
 0x5dc   :  { %968 = vmax.xlane.f32.xlu1 %v935_v26 }
 0x5dd   :  { %v945_v28 = vpop.f32.mrf.mxu1 }
 0x5de   :  { %972 = vmax.xlane.f32.xlu0 %v945_v28 }
 0x5e0   :  { %974 = vmax.xlane.f32.xlu1 %v1634_v27 }
 0x65d   :  { %v967_v32 = vpop.xlane.xlu0 %966 }
 0x65e   :  { %v2243_v36 = vsub.f32 %v1628_v23, %v967_v32 }
 0x660   :  { %v990_v38 = vmul.f32 1.442695, %v2243_v36 }
 0x661   :  { %v971_v33 = vpop.xlane.xlu1 %970  ;;  %v965_v34 = vpop.xlane.xlu0 %964 }
 0x662   :  { %v2245_v37 = vsub.f32 %v925_v24, %v965_v34  ;;  %v2248_v39 = vsub.f32 %v1631_v25, %v971_v33  ;;  %1649 = vpow2.f32 %v990_v38 }
 0x664   :  { %v988_v41 = vmul.f32 1.442695, %v2245_v37  ;;  %v994_v44 = vmul.f32 1.442695, %v2248_v39 }
 0x665   :  { %v969_v35 = vpop.xlane.xlu1 %968 }
 0x666   :  { %v2251_v42 = vsub.f32 %v935_v26, %v969_v35  ;;  %1651 = vpow2.f32 %v988_v41 }
 0x667   :  { %v973_v43 = vpop.xlane.xlu0 %972  ;;  %1653 = vpow2.f32 %v994_v44 }
 0x668   :  { %v992_v46 = vmul.f32 1.442695, %v2251_v42  ;;  %v2257_v47 = vsub.f32 %v945_v28, %v973_v43 }
 0x669   :  { %v975_v40 = vpop.xlane.xlu1 %974 }
 0x66a   :  { %v2254_v45 = vsub.f32 %v1634_v27, %v975_v40  ;;  %1655 = vpow2.f32 %v992_v46  ;;  %v996_v49 = vmul.f32 1.442695, %v2257_v47 }
 0x66c   :  { %v998_v48 = vmul.f32 1.442695, %v2254_v45 }
 0x66e   :  { %1657 = vpow2.f32 %v998_v48 }
 0x66f   :  { %1659 = vpow2.f32 %v996_v49  ;;  %v1650_v52 = vpop.eup %1649 }
 0x673   :  { %v1652_v53 = vpop.eup %1651 }
 0x674   :  { %v1654_v54 = vpop.eup %1653 }
 0x676   :  { %v829_v29 = vpop.f32.mrf.mxu0 }
 0x677   :  { %v833_v30 = vadd.f32 %v2083_v51, %v829_v29  ;;  %v1656_v55 = vpop.eup %1655 }
 0x678   :  { %v1593_v31 = vpop.f32.mrf.mxu0 }
 0x679   :  { %1052 = vst [vmem:[#allocation13] sm:$0xff] %v833_v30  ;;  %1636 = vmatmul.mubr.f32.gmra.mxu1 %v833_v30 }
 0x67b   :  { %v1658_v56 = vpop.eup %1657 }
 0x67c   :  { %v1660_v57 = vpop.eup %1659 }
 0x739   :  { %v1637_v50 = vpop.f32.mrf.mxu1 }
 0x73a   :  { %978 = vmax.xlane.f32.xlu1 %v1637_v50 }
 0x73b   :  { %v955_v51 = vpop.f32.mrf.mxu1 }
 0x73c   :  { %976 = vmax.xlane.f32.xlu0 %v955_v51 }
 0x73e   :  { %1006 = vadd.xlane.f32.xlu1 %v1650_v52 }
 0x740   :  { %1004 = vadd.xlane.f32.xlu0 %v1652_v53 }
 0x742   :  { %1010 = vadd.xlane.f32.xlu1 %v1654_v54 }
 0x744   :  { %1008 = vadd.xlane.f32.xlu0 %v1656_v55 }
 0x746   :  { %1014 = vadd.xlane.f32.xlu1 %v1658_v56 }
 0x748   :  { %1012 = vadd.xlane.f32.xlu0 %v1660_v57 }
 0x7c3   :  { %v979_v58 = vpop.xlane.xlu1 %978 }
 0x7c4   :  { %v2261_v59 = vsub.f32 %v1637_v50, %v979_v58 }
 0x7c5   :  { %v977_v60 = vpop.xlane.xlu0 %976 }
 0x7c6   :  { %v1002_v61 = vmul.f32 1.442695, %v2261_v59  ;;  %v2264_v62 = vsub.f32 %v955_v51, %v977_v60 }
 0x7c7   :  { %v1007_v63 = vpop.xlane.xlu1 %1006 }
 0x7c8   :  { %1661 = vpow2.f32 %v1002_v61  ;;  %v1000_v1 = vmul.f32 1.442695, %v2264_v62 }
 0x7c9   :  { %1663 = vlog2.f32 %v1007_v63  ;;  %v1005_v2 = vpop.xlane.xlu0 %1004 }
 0x7ca   :  { %1665 = vpow2.f32 %v1000_v1 }
 0x7cb   :  { %1667 = vlog2.f32 %v1005_v2  ;;  %v1011_v3 = vpop.xlane.xlu1 %1010 }
 0x7cc   :  { %1669 = vlog2.f32 %v1011_v3 }
 0x7cd   :  { %v1009_v4 = vpop.xlane.xlu0 %1008 }
 0x7ce   :  { %1671 = vlog2.f32 %v1009_v4 }
 0x7cf   :  { %v1015_v5 = vpop.xlane.xlu1 %1014 }
 0x7d0   :  { %1673 = vlog2.f32 %v1015_v5 }
 0x7d1   :  { %v1013_v6 = vpop.xlane.xlu0 %1012 }
 0x7d2   :  { %1675 = vlog2.f32 %v1013_v6 }
 0x7d5   :  { %v1662_v7 = vpop.eup %1661 }
 0x7d6   :  { %v1664_v8 = vpop.eup %1663  ;;  %1018 = vadd.xlane.f32.xlu1 %v1662_v7 }
 0x7d7   :  { %v1666_v0 = vpop.eup %1665  ;;  %v1023_v9 = vmul.f32 0.6931472, %v1664_v8 }
 0x7d8   :  { %v1668_v10 = vpop.eup %1667  ;;  %1016 = vadd.xlane.f32.xlu0 %v1666_v0 }
 0x7d9   :  { %v1670_v11 = vpop.eup %1669  ;;  %v1037_v12 = vsub.f32 %v2243_v36, %v1023_v9  ;;  %v1021_v13 = vmul.f32 0.6931472, %v1668_v10 }
 0x7da   :  { %v1027_v14 = vmul.f32 0.6931472, %v1670_v11 }
 0x7db   :  { %v1672_v15 = vpop.eup %1671  ;;  %1045 = vst [vmem:[#allocation12 + $0x8] sm:$0xff] %v1037_v12  ;;  %v1036_v16 = vsub.f32 %v2245_v37, %v1021_v13 }
 0x7dc   :  { %v1039_v17 = vsub.f32 %v2248_v39, %v1027_v14  ;;  %v1025_v18 = vmul.f32 0.6931472, %v1672_v15 }
 0x7dd   :  { %v1674_v19 = vpop.eup %1673  ;;  %1044 = vst [vmem:[#allocation12] sm:$0xff] %v1036_v16 }
 0x7de   :  { %1047 = vst [vmem:[#allocation12 + $0x18] sm:$0xff] %v1039_v17  ;;  %v1038_v20 = vsub.f32 %v2251_v42, %v1025_v18  ;;  %v1031_v21 = vmul.f32 0.6931472, %v1674_v19 }
 0x7df   :  { %v1676_v22 = vpop.eup %1675 }
 0x7e0   :  { %1046 = vst [vmem:[#allocation12 + $0x10] sm:$0xff] %v1038_v20  ;;  %v1041_v23 = vsub.f32 %v2254_v45, %v1031_v21  ;;  %v1029_v24 = vmul.f32 0.6931472, %v1676_v22 }
 0x7e2   :  { %1049 = vst [vmem:[#allocation12 + $0x28] sm:$0xff] %v1041_v23  ;;  %v1040_v25 = vsub.f32 %v2257_v47, %v1029_v24 }
 0x7e4   :  { %1048 = vst [vmem:[#allocation12 + $0x20] sm:$0xff] %v1040_v25 }
 0x7e5   :  { %1792 = shalt.err (!%p1789_p1)
}
 0x7e6   :  { %1074 = dma.vmem_to_hbm [thread:$0]  %s1072_s4, 128, %s2290_s6, [#allocation14]  }
 0x7e7   :  { %s1841_s24 = smov [#allocation12]  }
 0x7e8   :  { %s1058_s25 = sshll.u32 %s1841_s24, 4  ;;  %s1059_s25 = int_to_ptr.vmem [resolvable:$true] %s1058_s25 }
 0x7e9   :  { %s1801_s26 = scalar_lea.vmem %s1059_s25, 1024  ;;  %p1806_p3 = scmp.lt.s32.totalorder %s1059_s25, %s1059_s25 }
 0x7ea   :  { %p1802_p2 = scmp.ne.s32.totalorder %s1059_s25, %s1801_s26  ;;  %p1807_p4 = scmp.lt.s32.totalorder %s1801_s26, %s1801_s26 }
 0x7ec   :  { %p1808_p5 = por %p1807_p4, %p1806_p3 }
 0x7ee   :  { %p1809_p6 = pnand %p1808_p5, %p1802_p2 }
 0x85f   :  { %v1019_v26 = vpop.xlane.xlu1 %1018 }
 0x860   :  { %1677 = vlog2.f32 %v1019_v26 }
 0x861   :  { %v1017_v27 = vpop.xlane.xlu0 %1016 }
 0x862   :  { %1679 = vlog2.f32 %v1017_v27 }
 0x86d   :  { %v1678_v28 = vpop.eup %1677 }
 0x86e   :  { %v1035_v29 = vmul.f32 0.6931472, %v1678_v28 }
 0x86f   :  { %v1680_v30 = vpop.eup %1679 }
 0x870   :  { %v1043_v31 = vsub.f32 %v2261_v59, %v1035_v29  ;;  %v1033_v32 = vmul.f32 0.6931472, %v1680_v30 }
 0x872   :  { %1051 = vst [vmem:[#allocation12 + $0x38] sm:$0xff] %v1043_v31  ;;  %v1042_v33 = vsub.f32 %v2264_v62, %v1033_v32 }
 0x874   :  { %1050 = vst [vmem:[#allocation12 + $0x30] sm:$0xff] %v1042_v33 }
 0x875   :  { %1812 = shalt.err (!%p1809_p6)
}
 0x876   :  { %1064 = dma.vmem_to_hbm [thread:$0]  %s1059_s25, 1024, %s2289_s5, [#allocation5], %s1834_s7, %s1834_s7, %s1835_s8  }
 0x877   :  { %1827 = dma.done.wait [#allocation5], 1024  }
 0x878   :  { %1828 = vsyncadd [#allocation5], 4294966272 }
 0x879   :  { %1829 = dma.done.wait [#allocation14], 128  }
 0x87a   :  { %1830 = vsyncadd [#allocation14], 4294967168 }
 0x87b   :  { %1081 = vsyncpa [#allocation4], 1 }
 0x87c   :  { %1082 = vsyncpa [#allocation7], 1 }
 0x87d   :  { %1083 = vsyncpa [#allocation10], 1 }
 0x87e   :  { %1084 = vsyncpa [#allocation5], 1 }
 0x87f   :  { %1085 = vsyncpa [#allocation14], 1 }

</bundles_post_ra>
